<compile_context>
chip_gen: v5e
topology: v5e:2x2
jax: 0.10.0
libtpu: 0.0.40
codegen_flags: <defaults>
</compile_context>

<pallas_src>
import functools
import math

import jax
import jax.numpy as jnp
from jax.experimental import pallas as pl
from jax.experimental.pallas import tpu as pltpu

EPS = 1e-5
LANE = 128   # channels are zero-padded to a multiple of the TPU lane width
HALO = 8     # sublane-aligned halo rows on each side (supports K <= 17)


def _round_up(v, m):
    return ((v + m - 1) // m) * m


# ----------------------------------------------------------------------------
# Shared per-tile conv: im2col over [left-halo | main | right-halo], one MXU
# dot with bf16 inputs and f32 accumulation.
# ----------------------------------------------------------------------------
def _conv_tile(xm_ref, xl_ref, xr_ref, w_ref, *, K, tl):
    cip = xm_ref.shape[-1]
    xm = xm_ref[...].reshape(tl, cip)
    if K == 1:
        lhs = xm
    else:
        i = pl.program_id(1)
        last = pl.num_programs(1) - 1
        xl = xl_ref[...].reshape(HALO, cip)
        xr = xr_ref[...].reshape(HALO, cip)
        # The first tile's left halo and the last tile's right halo are the
        # conv 'same' zero padding (the loaded blocks there are clamped
        # placeholders / never-written trailing rows) -> force them to zero.
        xl = jnp.where(i == 0, jnp.zeros_like(xl), xl)
        xr = jnp.where(i == last, jnp.zeros_like(xr), xr)
        xx = jnp.concatenate([xl, xm, xr], axis=0)           # (tl + 16, Cip)
        p = (K - 1) // 2
        taps = [xx[HALO - p + k: HALO - p + k + tl, :] for k in range(K)]
        lhs = jnp.concatenate(taps, axis=1)                  # (tl, K*Cip)
    return jnp.dot(lhs, w_ref[...], preferred_element_type=jnp.float32)


# ----------------------------------------------------------------------------
# Pass 1: conv matmul + per-tile per-channel partial sums for BatchNorm.
# ----------------------------------------------------------------------------
def _conv_stats_kernel(*refs, K, tl, l_valid, needs_mask):
    if K > 1:
        xm_ref, xl_ref, xr_ref, w_ref, s_ref = refs
    else:
        xm_ref, w_ref, s_ref = refs
        xl_ref = xr_ref = None

    conv = _conv_tile(xm_ref, xl_ref, xr_ref, w_ref, K=K, tl=tl)  # (tl, Cop)
    cop = conv.shape[-1]
    if needs_mask:  # only when L % tl != 0 can a tile contain rows >= L
        rows = pl.program_id(1) * tl + jax.lax.broadcasted_iota(
            jnp.int32, (tl, cop), 0)
        conv = jnp.where(rows < l_valid, conv, 0.0)
    psum = jnp.sum(conv, axis=0, keepdims=True)
    psq = jnp.sum(conv * conv, axis=0, keepdims=True)
    s_ref[...] = jnp.concatenate(
        [psum, psq, jnp.zeros((6, cop), jnp.float32)], axis=0
    ).reshape(1, 1, 8, cop)


# ----------------------------------------------------------------------------
# Pass 2: recompute conv, apply BN scale/shift (+ReLU) (+residual), store bf16.
# ----------------------------------------------------------------------------
def _conv_apply_kernel(*refs, K, tl, l_valid, relu, has_res, needs_mask):
    refs = list(refs)
    xm_ref = refs.pop(0)
    xl_ref = refs.pop(0) if K > 1 else None
    xr_ref = refs.pop(0) if K > 1 else None
    w_ref = refs.pop(0)
    sc_ref = refs.pop(0)
    sh_ref = refs.pop(0)
    r_ref = refs.pop(0) if has_res else None
    o_ref = refs.pop(0)

    conv = _conv_tile(xm_ref, xl_ref, xr_ref, w_ref, K=K, tl=tl)  # (tl, Cop)
    cop = conv.shape[-1]
    out = conv * sc_ref[...].reshape(1, cop) + sh_ref[...].reshape(1, cop)
    if relu:
        out = jnp.maximum(out, 0.0)
    if needs_mask:
        rows = pl.program_id(1) * tl + jax.lax.broadcasted_iota(
            jnp.int32, (tl, cop), 0)
        out = jnp.where(rows < l_valid, out, 0.0)   # keep rows >= L zero
    if has_res:
        out = out + r_ref[...].reshape(tl, cop).astype(jnp.float32)
    o_ref[...] = out.astype(o_ref.dtype).reshape(1, tl, cop)


# ----------------------------------------------------------------------------
# Fused Conv1d('same') + BatchNorm1d(train) + optional ReLU + optional residual.
# x / residual / output all use the canonical layout (N, LP, C) bf16 with
# LP = n_lt*tl + HALO, valid data in rows [0, l_valid), rows >= l_valid zero.
# ----------------------------------------------------------------------------
def conv_bn_act(x, w_fold, K, gamma, beta, *, relu, residual=None,
                l_valid, tl, eps=EPS):
    N, lp, cip = x.shape
    kc, cop = w_fold.shape
    assert kc == K * cip
    assert K % 2 == 1 and (K - 1) // 2 <= HALO
    assert tl % HALO == 0 and (lp - HALO) % tl == 0
    n_lt = (lp - HALO) // tl
    hb = tl // HALO                       # 8-row halo blocks per tile
    needs_mask = (l_valid % tl) != 0
    has_halo = K > 1

    comp = pltpu.CompilerParams(
        dimension_semantics=("parallel", "parallel"),
        vmem_limit_bytes=48 * 1024 * 1024)

    in_args = [x]
    in_specs = [pl.BlockSpec((1, tl, cip), lambda n, i: (n, i, 0))]
    if has_halo:
        in_args += [x, x]
        in_specs += [
            pl.BlockSpec((1, HALO, cip),
                         lambda n, i: (n, jnp.maximum(i * hb - 1, 0), 0)),
            pl.BlockSpec((1, HALO, cip), lambda n, i: (n, (i + 1) * hb, 0)),
        ]
    in_args.append(w_fold)
    in_specs.append(pl.BlockSpec((kc, cop), lambda n, i: (0, 0)))

    flops = int(2 * N * n_lt * tl * kc * cop)
    x_bytes = int(N * n_lt * (tl + 2 * HALO) * cip * 2 + w_fold.nbytes)

    stats = pl.pallas_call(
        functools.partial(_conv_stats_kernel, K=K, tl=tl, l_valid=l_valid,
                          needs_mask=needs_mask),
        grid=(N, n_lt),
        in_specs=in_specs,
        out_specs=pl.BlockSpec((1, 1, 8, cop), lambda n, i: (n, i, 0, 0)),
        out_shape=jax.ShapeDtypeStruct((N, n_lt, 8, cop), jnp.float32),
        compiler_params=comp,
        cost_estimate=pl.CostEstimate(
            flops=flops, transcendentals=0,
            bytes_accessed=x_bytes + int(N * n_lt * 8 * cop * 4)),
    )(*in_args)

    # Global BatchNorm batch statistics from the per-tile partials (tiny XLA).
    cnt = float(N * l_valid)
    mean = jnp.sum(stats[:, :, 0, :], axis=(0, 1)) / cnt
    mean2 = jnp.sum(stats[:, :, 1, :], axis=(0, 1)) / cnt
    var = jnp.maximum(mean2 - mean * mean, 0.0)
    rstd = jax.lax.rsqrt(var + eps)
    scale = (gamma * rstd).reshape(1, cop).astype(jnp.float32)
    shift = (beta - mean * gamma * rstd).reshape(1, cop).astype(jnp.float32)

    in_args2 = list(in_args) + [scale, shift]
    in_specs2 = list(in_specs) + [
        pl.BlockSpec((1, cop), lambda n, i: (0, 0)),
        pl.BlockSpec((1, cop), lambda n, i: (0, 0)),
    ]
    res_bytes = 0
    if residual is not None:
        assert residual.shape == (N, lp, cop)
        in_args2.append(residual)
        in_specs2.append(pl.BlockSpec((1, tl, cop), lambda n, i: (n, i, 0)))
        res_bytes = int(N * n_lt * tl * cop * 2)

    out = pl.pallas_call(
        functools.partial(_conv_apply_kernel, K=K, tl=tl, l_valid=l_valid,
                          relu=relu, has_res=residual is not None,
                          needs_mask=needs_mask),
        grid=(N, n_lt),
        in_specs=in_specs2,
        out_specs=pl.BlockSpec((1, tl, cop), lambda n, i: (n, i, 0)),
        out_shape=jax.ShapeDtypeStruct((N, lp, cop), jnp.bfloat16),
        compiler_params=comp,
        cost_estimate=pl.CostEstimate(
            flops=flops, transcendentals=0,
            bytes_accessed=x_bytes + res_bytes + int(N * n_lt * tl * cop * 2)),
    )(*in_args2)

    return out


# ----------------------------------------------------------------------------
# Parameter construction (deterministic, mirrors MakeResNet.__init__).
# Conv weights in PyTorch layout (Co, Ci, K); kaiming_normal fan_out.
# ----------------------------------------------------------------------------
def init_params(key, layers, kernel_size, input_size, hidden_sizes):
    keys = list(jax.random.split(key, 256))
    kidx = [0]

    def nk():
        k = keys[kidx[0]]
        kidx[0] += 1
        return k

    def conv_w(ci, co, k):
        std = math.sqrt(2.0 / (co * k))  # kaiming_normal_, fan_out, relu
        return jax.random.normal(nk(), (co, ci, k), jnp.float32) * std

    def bn(c):
        return (jnp.ones((c,), jnp.float32), jnp.zeros((c,), jnp.float32))

    params = {
        "conv1": conv_w(input_size, hidden_sizes[0], 7),
        "bn1": bn(hidden_sizes[0]),
        "blocks": [],
    }
    start = hidden_sizes[0]
    for i in range(len(hidden_sizes)):
        out_c = hidden_sizes[i]
        layer_blocks = []
        for b in range(layers[i]):
            in_c = start if b == 0 else out_c
            blk = {
                "conv1": conv_w(in_c, out_c, kernel_size[0]),
                "bn1": bn(out_c),
                "conv2": conv_w(out_c, out_c, kernel_size[1]),
                "bn2": bn(out_c),
            }
            if b == 0:  # downsample always created for the first block
                blk["down_conv"] = conv_w(in_c, out_c, 1)
                blk["down_bn"] = bn(out_c)
            layer_blocks.append(blk)
        params["blocks"].append(layer_blocks)
        start = out_c
    return params


# ----------------------------------------------------------------------------
# One-time packing: transpose + lane-pad + fold conv weights, pad BN params.
# gamma/beta are zero-padded so padded output lanes get scale=shift=0.
# ----------------------------------------------------------------------------
def pack_params(params):
    def pack_conv(w):
        co, ci, k = w.shape
        cip, cop = _round_up(ci, LANE), _round_up(co, LANE)
        wt = jnp.transpose(w, (2, 1, 0))                       # (K, Ci, Co)
        wt = jnp.pad(wt, ((0, 0), (0, cip - ci), (0, cop - co)))
        return wt.reshape(k * cip, cop).astype(jnp.bfloat16), k

    def pack_bn(gb):
        g, b = gb
        cop = _round_up(g.shape[0], LANE)
        return (jnp.pad(g, (0, cop - g.shape[0])).astype(jnp.float32),
                jnp.pad(b, (0, cop - b.shape[0])).astype(jnp.float32))

    def stage(w, gb):
        wf, k = pack_conv(w)
        g, b = pack_bn(gb)
        return {"w": wf, "K": k, "gamma": g, "beta": b}

    packed = {"conv1": stage(params["conv1"], params["bn1"]), "blocks": []}
    for layer in params["blocks"]:
        packed_layer = []
        for blk in layer:
            p = {"conv1": stage(blk["conv1"], blk["bn1"]),
                 "conv2": stage(blk["conv2"], blk["bn2"])}
            if "down_conv" in blk:
                p["down"] = stage(blk["down_conv"], blk["down_bn"])
            packed_layer.append(p)
        packed["blocks"].append(packed_layer)
    packed["c_final"] = params["blocks"][-1][-1]["bn2"][0].shape[0]
    return packed


# ----------------------------------------------------------------------------
# Forward pass (Pallas).  Accepts / returns PyTorch NCL layout.
# ----------------------------------------------------------------------------
def forward_pallas(packed, x_ncl, kernel_size=None, block_l=None):
    n, c_in, L = x_ncl.shape
    cip = _round_up(c_in, LANE)

    tl = block_l if block_l is not None else min(512, _round_up(L, HALO))
    tl = max(HALO, _round_up(tl, HALO))
    n_lt = pl.cdiv(L, tl)
    lp = n_lt * tl + HALO

    # One-time pack into the canonical (N, LP, Cip) bf16 layout.
    x = jnp.transpose(x_ncl, (0, 2, 1))                        # NCL -> NLC
    x = jnp.pad(x, ((0, 0), (0, lp - L), (0, cip - c_in))).astype(jnp.bfloat16)

    s = packed["conv1"]
    x = conv_bn_act(x, s["w"], s["K"], s["gamma"], s["beta"],
                    relu=True, l_valid=L, tl=tl)

    for layer in packed["blocks"]:
        for blk in layer:
            if "down" in blk:
                d = blk["down"]
                identity = conv_bn_act(x, d["w"], d["K"], d["gamma"],
                                       d["beta"], relu=False, l_valid=L, tl=tl)
            else:
                identity = x
            c1 = blk["conv1"]
            out = conv_bn_act(x, c1["w"], c1["K"], c1["gamma"], c1["beta"],
                              relu=True, l_valid=L, tl=tl)
            # out = relu(bn2(conv2(out))) + identity   (ReLU before the add!)
            c2 = blk["conv2"]
            x = conv_bn_act(out, c2["w"], c2["K"], c2["gamma"], c2["beta"],
                            relu=True, residual=identity, l_valid=L, tl=tl)

    c_out = packed["c_final"]
    return jnp.transpose(x[:, :L, :c_out].astype(jnp.float32), (0, 2, 1))


# ----------------------------------------------------------------------------
# Pure-JAX reference with the same numerics (bf16 matmul inputs / storage,
# f32 accumulation & BN math) for verification.
# ----------------------------------------------------------------------------
def _ref_conv_bn_act(x, w_torch, gamma, beta, pad, relu, residual=None, eps=EPS):
    w = jnp.transpose(w_torch, (2, 1, 0)).astype(jnp.bfloat16)   # (K, Ci, Co)
    y = jax.lax.conv_general_dilated(
        x.astype(jnp.bfloat16), w, window_strides=(1,), padding=[(pad, pad)],
        dimension_numbers=("NWC", "WIO", "NWC"),
        preferred_element_type=jnp.float32)
    mean = jnp.mean(y, axis=(0, 1))
    var = jnp.maximum(jnp.mean(y * y, axis=(0, 1)) - mean * mean, 0.0)
    rstd = jax.lax.rsqrt(var + eps)
    out = y * (gamma * rstd) + (beta - mean * gamma * rstd)
    if relu:
        out = jnp.maximum(out, 0.0)
    if residual is not None:
        out = out + residual.astype(jnp.float32)
    return out.astype(jnp.bfloat16)


def forward_ref(params, x_ncl, kernel_size):
    x = jnp.transpose(x_ncl, (0, 2, 1)).astype(jnp.bfloat16)
    x = _ref_conv_bn_act(x, params["conv1"], params["bn1"][0], params["bn1"][1],
                         3, True)
    k0, k1 = kernel_size
    for layer in params["blocks"]:
        for blk in layer:
            if "down_conv" in blk:
                identity = _ref_conv_bn_act(x, blk["down_conv"],
                                            blk["down_bn"][0], blk["down_bn"][1],
                                            0, False)
            else:
                identity = x
            out = _ref_conv_bn_act(x, blk["conv1"], blk["bn1"][0], blk["bn1"][1],
                                   k0 // 2, True)
            out = _ref_conv_bn_act(out, blk["conv2"], blk["bn2"][0],
                                   blk["bn2"][1], k1 // 2, True,
                                   residual=identity)
            x = out
    return jnp.transpose(x, (0, 2, 1)).astype(jnp.float32)


# ----------------------------------------------------------------------------
if __name__ == "__main__":
    # MakeResNet(layers=[1, 1], kernel_size=[3, 3], input_size=4,
    #            hidden_sizes=[8, 16]);  input (N=2, C=4, L=19).
    layers = [1, 1]
    kernel_size = [3, 3]
    input_size = 4
    hidden_sizes = [8, 16]
    N, L = 2, 19  # L not a multiple of the tile -> exercises the mask path

    key = jax.random.PRNGKey(0)
    k_params, k_x = jax.random.split(key)
    params = init_params(k_params, layers, kernel_size, input_size, hidden_sizes)
    packed = pack_params(params)

    x = jax.random.normal(k_x, (N, input_size, L), jnp.float32)

    # block_l=8 forces a multi-tile L grid even at this toy length so the
    # halo-block, boundary-masking and cross-tile-BN paths are all exercised.
    out = jax.block_until_ready(forward_pallas(packed, x, kernel_size, block_l=8))
    ref = jax.block_until_ready(forward_ref(params, x, kernel_size))

    assert out.shape == (N, hidden_sizes[-1], L), out.shape
    err = float(jnp.max(jnp.abs(out - ref)))
    assert err < 2e-2, err
    print("KERNEL_OK")
</pallas_src>

<mosaic_0001>
module attributes {stable_mosaic.version = 11 : i64} {
  func.func @_conv_stats_kernel(%arg0: i32, %arg1: i32, %arg2: memref<1x8x128xbf16, #tpu.memory_space<vmem>>, %arg3: memref<1x8x128xbf16, #tpu.memory_space<vmem>>, %arg4: memref<1x8x128xbf16, #tpu.memory_space<vmem>>, %arg5: memref<896x128xbf16, #tpu.memory_space<vmem>>, %arg6: memref<1x1x8x128xf32, #tpu.memory_space<vmem>>) attributes {dimension_semantics = [#tpu.dimension_semantics<parallel>, #tpu.dimension_semantics<parallel>], iteration_bounds = array<i64: 2, 3>, scalar_prefetch = 0 : i64, scratch_operands = 0 : i64, tpu.core_type = #tpu.core_type<tc>, window_params = [{transform_indices = @transform_0, window_bounds = array<i64: 1, 8, 128>}, {transform_indices = @transform_1, window_bounds = array<i64: 1, 8, 128>}, {transform_indices = @transform_2, window_bounds = array<i64: 1, 8, 128>}, {pipeline_mode = #tpu.pipeline_mode<synchronous>, transform_indices = @transform_3, window_bounds = array<i64: 896, 128>}, {transform_indices = @transform_4, window_bounds = array<i64: 1, 1, 8, 128>}]} {
    %c0 = arith.constant 0 : index
    %c0_0 = arith.constant 0 : index
    %c0_1 = arith.constant 0 : index
    %0 = vector.load %arg2[%c0, %c0_0, %c0_1] : memref<1x8x128xbf16, #tpu.memory_space<vmem>>, vector<1x8x128xbf16>
    %1 = vector.shape_cast %0 : vector<1x8x128xbf16> to vector<8x128xbf16>
    %c0_2 = arith.constant 0 : index
    %c0_3 = arith.constant 0 : index
    %c0_4 = arith.constant 0 : index
    %2 = vector.load %arg3[%c0_2, %c0_3, %c0_4] : memref<1x8x128xbf16, #tpu.memory_space<vmem>>, vector<1x8x128xbf16>
    %3 = vector.shape_cast %2 : vector<1x8x128xbf16> to vector<8x128xbf16>
    %c0_5 = arith.constant 0 : index
    %c0_6 = arith.constant 0 : index
    %c0_7 = arith.constant 0 : index
    %4 = vector.load %arg4[%c0_5, %c0_6, %c0_7] : memref<1x8x128xbf16, #tpu.memory_space<vmem>>, vector<1x8x128xbf16>
    %5 = vector.shape_cast %4 : vector<1x8x128xbf16> to vector<8x128xbf16>
    %c0_i32 = arith.constant 0 : i32
    %6 = arith.cmpi eq, %arg1, %c0_i32 : i32
    %cst = arith.constant 0.000000e+00 : bf16
    %7 = vector.broadcast %cst : bf16 to vector<8x128xbf16>
    %8 = arith.select %6, %7, %3 : vector<8x128xbf16>
    %c2_i32 = arith.constant 2 : i32
    %9 = arith.cmpi eq, %arg1, %c2_i32 : i32
    %cst_8 = arith.constant 0.000000e+00 : bf16
    %10 = vector.broadcast %cst_8 : bf16 to vector<8x128xbf16>
    %11 = arith.select %9, %10, %5 : vector<8x128xbf16>
    %12 = tpu.concatenate %8, %1, %11 in 0 : vector<8x128xbf16>, vector<8x128xbf16>, vector<8x128xbf16> -> vector<24x128xbf16>
    %13 = vector.extract_strided_slice %12 {offsets = [5, 0], sizes = [8, 128], strides = [1, 1]} : vector<24x128xbf16> to vector<8x128xbf16>
    %14 = vector.extract_strided_slice %12 {offsets = [6, 0], sizes = [8, 128], strides = [1, 1]} : vector<24x128xbf16> to vector<8x128xbf16>
    %15 = vector.extract_strided_slice %12 {offsets = [7, 0], sizes = [8, 128], strides = [1, 1]} : vector<24x128xbf16> to vector<8x128xbf16>
    %16 = vector.extract_strided_slice %12 {offsets = [8, 0], sizes = [8, 128], strides = [1, 1]} : vector<24x128xbf16> to vector<8x128xbf16>
    %17 = vector.extract_strided_slice %12 {offsets = [9, 0], sizes = [8, 128], strides = [1, 1]} : vector<24x128xbf16> to vector<8x128xbf16>
    %18 = vector.extract_strided_slice %12 {offsets = [10, 0], sizes = [8, 128], strides = [1, 1]} : vector<24x128xbf16> to vector<8x128xbf16>
    %19 = vector.extract_strided_slice %12 {offsets = [11, 0], sizes = [8, 128], strides = [1, 1]} : vector<24x128xbf16> to vector<8x128xbf16>
    %20 = tpu.concatenate %13, %14, %15, %16, %17, %18, %19 in 1 : vector<8x128xbf16>, vector<8x128xbf16>, vector<8x128xbf16>, vector<8x128xbf16>, vector<8x128xbf16>, vector<8x128xbf16>, vector<8x128xbf16> -> vector<8x896xbf16>
    %c0_9 = arith.constant 0 : index
    %c0_10 = arith.constant 0 : index
    %21 = vector.load %arg5[%c0_9, %c0_10] : memref<896x128xbf16, #tpu.memory_space<vmem>>, vector<896x128xbf16>
    %cst_11 = arith.constant dense<0.000000e+00> : vector<8x128xf32>
    %22 = tpu.matmul %20, %21, %cst_11 {dimension_numbers = #tpu.dot_dimension_numbers<[1], [0], [0], [1], [0, 0, 1, 1], [], []>} : vector<8x896xbf16>, vector<896x128xbf16>, vector<8x128xf32> -> vector<8x128xf32>
    %c8_i32 = arith.constant 8 : i32
    %23 = arith.muli %arg1, %c8_i32 : i32
    %24 = tpu.iota {dimensions = array<i32: 0>} : vector<8x128xi32>
    %25 = vector.broadcast %23 : i32 to vector<8x128xi32>
    %26 = arith.addi %25, %24 : vector<8x128xi32>
    %c19_i32 = arith.constant 19 : i32
    %27 = vector.broadcast %c19_i32 : i32 to vector<8x128xi32>
    %28 = arith.cmpi slt, %26, %27 : vector<8x128xi32>
    %cst_12 = arith.constant 0.000000e+00 : f32
    %29 = vector.broadcast %cst_12 : f32 to vector<8x128xf32>
    %30 = arith.select %28, %22, %29 : vector<8x128xi1>, vector<8x128xf32>
    %cst_13 = arith.constant dense<0.000000e+00> : vector<128xf32>
    %31 = vector.multi_reduction <add>, %30, %cst_13 [0] : vector<8x128xf32> to vector<128xf32>
    %32 = vector.shape_cast %31 : vector<128xf32> to vector<1x128xf32>
    %33 = arith.mulf %30, %30 : vector<8x128xf32>
    %cst_14 = arith.constant dense<0.000000e+00> : vector<128xf32>
    %34 = vector.multi_reduction <add>, %33, %cst_14 [0] : vector<8x128xf32> to vector<128xf32>
    %35 = vector.shape_cast %34 : vector<128xf32> to vector<1x128xf32>
    %cst_15 = arith.constant 0.000000e+00 : f32
    %36 = vector.broadcast %cst_15 : f32 to vector<6x128xf32>
    %37 = tpu.concatenate %32, %35, %36 in 0 : vector<1x128xf32>, vector<1x128xf32>, vector<6x128xf32> -> vector<8x128xf32>
    %38 = vector.shape_cast %37 : vector<8x128xf32> to vector<1x1x8x128xf32>
    %c0_16 = arith.constant 0 : index
    %c0_17 = arith.constant 0 : index
    %c0_18 = arith.constant 0 : index
    %c0_19 = arith.constant 0 : index
    %39 = vector.load %arg6[%c0_16, %c0_17, %c0_18, %c0_19] : memref<1x1x8x128xf32, #tpu.memory_space<vmem>>, vector<1x1x8x128xf32>
    tpu.vector_store %arg6[%c0_16, %c0_17, %c0_18, %c0_19], %38 {strides = array<i32>} : memref<1x1x8x128xf32, #tpu.memory_space<vmem>>, vector<1x1x8x128xf32>,
    return
  }
  func.func @transform_0(%arg0: i32, %arg1: i32) -> (i32, i32, i32) {
    %c0_i32 = arith.constant 0 : i32
    %c0_i32_0 = arith.constant 0 : i32
    return %arg0, %arg1, %c0_i32 : i32, i32, i32
  }
  func.func @transform_1(%arg0: i32, %arg1: i32) -> (i32, i32, i32) {
    %c1_i32 = arith.constant 1 : i32
    %0 = arith.muli %arg1, %c1_i32 : i32
    %c1_i32_0 = arith.constant 1 : i32
    %1 = arith.subi %0, %c1_i32_0 : i32
    %c0_i32 = arith.constant 0 : i32
    %2 = arith.maxsi %1, %c0_i32 : i32
    %c0_i32_1 = arith.constant 0 : i32
    %c0_i32_2 = arith.constant 0 : i32
    return %arg0, %2, %c0_i32_1 : i32, i32, i32
  }
  func.func @transform_2(%arg0: i32, %arg1: i32) -> (i32, i32, i32) {
    %c1_i32 = arith.constant 1 : i32
    %0 = arith.addi %arg1, %c1_i32 : i32
    %c1_i32_0 = arith.constant 1 : i32
    %1 = arith.muli %0, %c1_i32_0 : i32
    %c0_i32 = arith.constant 0 : i32
    %c0_i32_1 = arith.constant 0 : i32
    return %arg0, %1, %c0_i32 : i32, i32, i32
  }
  func.func @transform_3(%arg0: i32, %arg1: i32) -> (i32, i32) {
    %c0_i32 = arith.constant 0 : i32
    %c0_i32_0 = arith.constant 0 : i32
    %c0_i32_1 = arith.constant 0 : i32
    return %c0_i32, %c0_i32_0 : i32, i32
  }
  func.func @transform_4(%arg0: i32, %arg1: i32) -> (i32, i32, i32, i32) {
    %c0_i32 = arith.constant 0 : i32
    %c0_i32_0 = arith.constant 0 : i32
    %c0_i32_1 = arith.constant 0 : i32
    return %arg0, %arg1, %c0_i32, %c0_i32_0 : i32, i32, i32, i32
  }
}

</mosaic_0001>

<bundles_post_ra>
// kernel: tpu_custom_call.1
= control target key start
LH: loop header
LB: loop body
LE: loop exit
PB: predicated region body
PF: predicated region fallthrough
CT: control target
= control target key end

     0   :  { %s2291_s0 = inlined_call_operand.hbm [shape: bf16[2,32,128], index: 0, kind: input, shape index: {}]   ;;  %s2292_s1 = inlined_call_operand.hbm [shape: bf16[2,32,128], index: 1, kind: input, shape index: {}]   ;;  %s2293_s2 = inlined_call_operand.hbm [shape: bf16[2,32,128], index: 2, kind: input, shape index: {}]   ;;  %s2294_s3 = inlined_call_operand.hbm [shape: bf16[896,128], index: 3, kind: input, shape index: {}]   ;;  %s2295_s4 = inlined_call_operand.hbm [shape: f32[2,3,8,128], index: 4, kind: output, shape index: {}]  }
   0x1   :  { %2306 = sst [smem:[#allocation27_spill]] %s2291_s0 }
   0x2   :  { %2307 = sst [smem:[#allocation28_spill]] %s2292_s1 }
   0x3   :  { %2308 = sst [smem:[#allocation29_spill]] %s2293_s2 }
   0x4   :  { %2309 = sst [smem:[#allocation30_spill]] %s2294_s3 }
   0x5   :  { %2310 = sst [smem:[#allocation31_spill]] %s2295_s4 }
   0x6   :  { %9 = vsyncpa [#allocation3], 0 }
   0x7   :  { %11 = vsyncpa [#allocation3 + $0x1], 0 }
   0x8   :  { %12 = vsyncpa [#allocation6], 0 }
   0x9   :  { %14 = vsyncpa [#allocation6 + $0x1], 0 }
   0xa   :  { %15 = vsyncpa [#allocation9], 0 }
   0xb   :  { %16 = vsyncpa [#allocation4], 0 }
   0xc   :  { %18 = vsyncpa [#allocation4 + $0x1], 0  ;;  %s1949_s15 = smov 0   ;;  %s1951_s16 = smov 0  }
   0xd   :  { %s1953_s17 = smov 0   ;;  %s1955_s18 = smov 0  }
   0xe   :  { %s1957_s19 = smov 0   ;;  %s1959_s20 = smov 0  }
   0xf   :  { %s1961_s21 = smov 0   ;;  %s1963_s22 = smov 0  }
  0x10   :  { %s1965_s23 = smov 0   ;;  %s1967_s24 = smov 0  }
  0x11   :  { %s1969_s25 = smov 0   ;;  %s1971_s26 = smov 0  }
  0x12   :  { %s1973_s27 = smov 0   ;;  %s1975_s28 = smov 0  }
  0x13 LB: > { %2311 = sst [smem:[#allocation16_spill]] %s1883_s19  ;;  %s2020_s29 = sadd.s32 4294967295, %s1919_s28   ;;  %s1919_s28 = sphi %s1975_s28, %s24_s28   ;;  %s1915_s27 = sphi %s1973_s27, %s2360_s27   ;;  %s1911_s26 = sphi %s1971_s26, %s2359_s26   ;;  %s1907_s25 = sphi %s1969_s25, %s2348_s25   ;;  %s1903_s24 = sphi %s1967_s24, %s2347_s24   ;;  %s1899_s23 = sphi %s1965_s23, %s2346_s23   ;;  %s1895_s22 = sphi %s1963_s22, %s2358_s22   ;;  %s1891_s21 = sphi %s1961_s21, %s2357_s21   ;;  %s1887_s20 = sphi %s1959_s20, %s2356_s20   ;;  %s1883_s19 = sphi %s1957_s19, %s2355_s19   ;;  %s1879_s18 = sphi %s1955_s18, %s2343_s18   ;;  %s1875_s17 = sphi %s1953_s17, %s2354_s17   ;;  %s1871_s16 = sphi %s1951_s16, %s2353_s16   ;;  %s1867_s15 = sphi %s1949_s15, %s2352_s15  }
  0x14   : > { %2312 = sst [smem:[#allocation17_spill]] %s1899_s23  ;;  %s33_s30 = sadd.s32 1, %s1911_s26 }
  0x15   : > { %2313 = sst [smem:[#allocation18_spill]] %s1903_s24  ;;  %p34_p0 = scmp.ge.s32.totalorder %s33_s30, 3 }
  0x16   : > { %2314 = sst [smem:[#allocation19_spill]] %s1907_s25  ;;  %s36_s5 = sadd.s32 1, %s1915_s27 }
  0x17   : > { %2315 = sst [smem:[#allocation20_spill]] %s1911_s26  ;;  %p53_p1 = scmp.eq.s32.totalorder %s1919_s28, 0 }
  0x18   : > { %2316 = sst [smem:[#allocation21_spill]] %s1915_s27  ;;  %p59_p2 = scmp.eq.s32.totalorder %s2020_s29, 0 }
  0x19   : > { %s2026_s6 = scalar_select %p34_p0, 0, %s33_s30  }
  0x1a   : > { %s2362_s5 = smov (!%p34_p0, %s36_s5), %s1915_s27  ;;  %s1185_s8 = sadd.s32 4294967295, %s1911_s26 }
  0x1b   : > { %2317 = sst [smem:[#allocation22_spill]] %s2026_s6  ;;  %s41_s7 = ssub.s32 %s1911_s26, %s2026_s6 }
  0x1c   : > { %p38_p3 = scmp.ge.s32.totalorder %s2362_s5, 2  ;;  %p69_p4 = scmp.gt.s32.totalorder %s1185_s8, 0 }
  0x1d   : > { %s1186_s9 = sadd.s32 4294967295, %s2026_s6  ;;  %s79_s10 = sadd.s32 1, %s1887_s20 }
  0x1e   : > { %s2364_s5 = smov (%p38_p3, %s2362_s5), 0  ;;  %s2366_s8 = smov (!%p69_p4, %s1185_s8), 0 }
  0x1f   : > { %2318 = sst [smem:[#allocation23_spill]] %s2364_s5  ;;  %s40_s11 = ssub.s32 %s1915_s27, %s2364_s5 }
  0x20   : > { %p72_p5 = scmp.gt.s32.totalorder %s1186_s9, 0  ;;  %s2038_s12 = sor.u32 %s41_s7, %s40_s11 }
  0x21   : > { %p86_p6 = scmp.ne.s32.totalorder %s1887_s20, %s1883_s19  ;;  %p43_p7 = scmp.eq.s32.totalorder %s2038_s12, 0 }
  0x22   : > { %p92_p8 = scmp.ne.s32.totalorder %s1883_s19, %s1879_s18  ;;  %s2368_s9 = smov (!%p72_p5, %s1186_s9), 0 }
  0x23   : > { %p2047_p9 = por %p86_p6, %p53_p1  ;;  %s75_s7 = ssub.s32 %s2366_s8, %s2368_s9 }
  0x24   : > { %p2053_p10 = por %p92_p8, %p59_p2  ;;  %s103_s5 = sadd.s32 1, %s2026_s6 }
  0x25   : > { %s76_s4 = sor.u32 %s75_s7, %s40_s11  ;;  %s105_s25 = ssub.s32 %s33_s30, %s103_s5 }
  0x26   : > { %s2320_s14 = scalar_select %p2053_p10, 1, 0 }
  0x27   : > { %p77_p11 = scmp.eq.s32.totalorder %s76_s4, 0  ;;  %s106_s24 = sor.u32 %s105_s25, %s40_s11 }
  0x28   : > { %2321 = sst [smem:[#allocation24_spill]] %s2320_s14  ;;  %p2058_p12 = scmp.eq.s32.totalorder %s106_s24, 0 }
  0x29   : > { %s2063_s19 = scalar_select %p77_p11, %s1887_s20, %s79_s10  }
  0x2a   : > { %p1523_p13 = scmp.lt.s32.totalorder %s1919_s28, 6  ;;  %s1191_s2 = sshll.u32 %s1915_s27, 2 }
  0x2b   : > { %2323 = sst [smem:[#allocation25_spill]] %s2063_s19  ;;  %s230_s0 = sand.u32 1, %s1919_s28  }
  0x2c   : > { %s232_s14 = sand.u32 1, %s1887_s20   ;;  %s241_s7 = sadd.s32 %s1191_s2, %s2366_s8 }
  0x2d   : > { %s1193_s9 = sshll.u32 %s232_s14, 2  ;;  %s1196_s30 = sshll.u32 %s241_s7, 2 }
  0x2e   : > { %s2324_s1 = sld [smem:[#allocation28_spill]]  ;;  %s234_s24 = scalar_lea.vmem [#allocation5], %s1193_s9 }
  0x2f   : > { %s247_s11 = sshll.u32 %s234_s24, 4  ;;  %p1512_p0 = pnand %p1523_p13, %p2047_p9  ;;  %s248_s11 = int_to_ptr.vmem [resolvable:$true] %s247_s11 }
  0x30   : > { %s2078_s10 = scalar_lea.sflag [#allocation6], %s230_s0  ;;  %p1187_p3 = scmp.ge.s32.totalorder %s1919_s28, 1 }
  0x31   : > { %p182_p4 = scmp.lt.s32.totalorder %s1919_s28, 7  ;;  %s2325_s3 = sld [smem:[#allocation30_spill]] }
  0x32   : > { %s1922_s7 = smov 64   ;;  %s1184_s4 = sadd.s32 4294967294, %s1919_s28  }
  0x33   : > { %p2086_p5 = pnand %p1187_p3, %p182_p4  ;;  %s45_s25 = sadd.s32 1, %s1899_s23 }
  0x34   : > { %s243_s5 = scalar_lea.hbm %s2324_s1, %s1196_s30  ;;  %s1923_s30 = smov 4  }
  0x35   : > { %s245_s6 = sshll.u32 %s243_s5, 4  ;;  %p1504_p6 = pneg %p2086_p5  ;;  %s246_s6 = int_to_ptr.hbm [resolvable:$true] %s245_s6 }
  0x36   : > { %1514 = dma.hbm_to_vmem [thread:$0]  (!%p1512_p0), %s246_s6, 64, %s248_s11, %s2078_s10  }
  0x37   : > { %s193_s13 = sshll.u32 %s2325_s3, 4  ;;  %s1921_s6 = smov [#allocation8]   ;;  %s194_s13 = int_to_ptr.hbm [resolvable:$true] %s193_s13 }
  0x38   : > { %s195_s9 = sshll.u32 %s1921_s6, 4  ;;  %p1505_p8 = pnand %p1504_p6, %p59_p2  ;;  %s196_s9 = int_to_ptr.vmem [resolvable:$true] %s195_s9 }
  0x39   : > { %s2099_s5 = scalar_select %p43_p7, %s1899_s23, %s45_s25  }
  0x3a   : > { %1507 = dma.hbm_to_vmem [thread:$0]  (!%p1505_p8), %s194_s13, 7168, %s196_s9, [#allocation9], %s1922_s7, %s1922_s7, %s1923_s30  }
  0x3b   : > { %2327 = sst [smem:[#allocation26_spill]] %s2099_s5  ;;  %p52_p9 = scmp.ne.s32.totalorder %s1899_s23, %s1895_s22 }
  0x3c   : > { %p58_p11 = scmp.ne.s32.totalorder %s1895_s22, %s1891_s21  ;;  %p169_p0 = scmp.eq.s32.totalorder %s2020_s29, 5 }
  0x3d   : > { %p175_p3 = scmp.eq.s32.totalorder %s1184_s4, 5  ;;  %p2108_p4 = por %p53_p1, %p52_p9 }
  0x3e   : > { %p2114_p6 = por %p59_p2, %p58_p11  ;;  %p2118_p8 = por %p169_p0, %p52_p9 }
  0x3f   : > { %p2122_p7 = por %p175_p3, %p58_p11  ;;  %s209_s14 = sand.u32 1, %s1899_s23  }
  0x40   : > { %s217_s13 = sadd.s32 %s1911_s26, %s1191_s2  ;;  %s1190_s6 = sshll.u32 %s209_s14, 2 }
  0x41   : > { %s1192_s9 = sshll.u32 %s217_s13, 2  ;;  %s2332_s4 = sld [smem:[#allocation27_spill]] }
  0x42   : > { %s213_s1 = scalar_lea.vmem [#allocation2], %s1190_s6  ;;  %p1509_p9 = pnand %p1523_p13, %p2108_p4 }
  0x43   : > { %s223_s3 = sshll.u32 %s213_s1, 4  ;;  %s2333_s26 = sld [smem:[#allocation29_spill]]  ;;  %s224_s3 = int_to_ptr.vmem [resolvable:$true] %s223_s3 }
  0x44   : > { %s210_s19 = scalar_lea.sflag [#allocation3], %s209_s14  ;;  %s109_s13 = sadd.s32 1, %s1875_s17 }
  0x45   : > { %p116_p11 = scmp.ne.s32.totalorder %s1875_s17, %s1871_s16  ;;  %p122_p3 = scmp.ne.s32.totalorder %s1871_s16, %s1867_s15 }
  0x46   : > { %s2146_s6 = scalar_select %p2058_p12, %s1875_s17, %s109_s13  }
  0x47   : > { %s219_s25 = scalar_lea.hbm %s2332_s4, %s1192_s9  ;;  %p118_p0 = por %p116_p11, %p53_p1 }
  0x48   : > { %s221_s5 = sshll.u32 %s219_s25, 4  ;;  %s256_s1 = sand.u32 1, %s1875_s17   ;;  %s222_s5 = int_to_ptr.hbm [resolvable:$true] %s221_s5 }
  0x49   : > { %s1088_s23 = scalar_lea.hbm %s2333_s26, %s1192_s9  ;;  %p2155_p4 = por %p122_p3, %p59_p2 }
  0x4a   : > { %1511 = dma.hbm_to_vmem [thread:$0]  (!%p1509_p9), %s222_s5, 64, %s224_s3, %s210_s19  }
  0x4b   : > { %s1089_s24 = scalar_lea.hbm %s1088_s23, 4  ;;  %s1197_s26 = sshll.u32 %s256_s1, 2 }
  0x4c   : > { %s267_s27 = sshll.u32 %s1089_s24, 4  ;;  %s258_s3 = scalar_lea.vmem [#allocation7], %s1197_s26  ;;  %s268_s27 = int_to_ptr.hbm [resolvable:$true] %s267_s27 }
  0x4d   : > { %s269_s19 = sshll.u32 %s258_s3, 4  ;;  %p1515_p9 = pnand %p1523_p13, %p118_p0  ;;  %s270_s19 = int_to_ptr.vmem [resolvable:$true] %s269_s19 }
  0x4e   : > { %278 = sbr.rel (%p2086_p5) target bundleno = 320 (0x140), region = 36  ;;  %s2165_s15 = sand.u32 (!%p2086_p5), 1, %s1895_s22  }
  0x4f   : > { %1517 = dma.hbm_to_vmem [thread:$0]  (!%p1515_p9), %s268_s27, 64, %s270_s19, %s2078_s10  }
  0x50   : > { %s1201_s23 = sshll.u32 (!%p2086_p5), %s2165_s15, 2  ;;  %s281_s18 = scalar_lea.sflag (!%p2086_p5), [#allocation3], %s2165_s15 }
  0x51   : > { %s2169_s5 = scalar_lea.vmem (!%p2086_p5), [#allocation2], %s1201_s23 }
  0x53   : > { %1846 = dma.done.wait (%p2114_p6), %s281_s18, 64  }
  0x54   : > { %1848 = vsyncadd (%p2114_p6), %s281_s18, 4294967232  ;;  %s2335_s10 = sld [smem:[#allocation16_spill]]  ;;  %s290_s0 = sand.u32 1, %s2020_s29  }
  0x55   : > { %s291_s4 = scalar_lea.sflag [#allocation6], %s290_s0 }
  0x5a   : > { %s292_s9 = sand.u32 1, %s2335_s10  }
  0x5b   : > { %s2177_s30 = sshll.u32 %s292_s9, 2 }
  0x5c   : > { %s294_s25 = scalar_lea.vmem [#allocation5], %s2177_s30 }
  0x5d   : > { %1850 = dma.done.wait (%p2053_p10), %s291_s4, 64  }
  0x5e   : > { %1852 = vsyncadd (%p2053_p10), %s291_s4, 4294967232  ;;  %s302_s2 = sand.u32 1, %s1871_s16  }
  0x5f   : > { %s2185_s11 = sshll.u32 %s302_s2, 2 }
  0x60   : > { %s304_s13 = scalar_lea.vmem [#allocation7], %s2185_s11 }
  0x61   : > { %1854 = dma.done.wait (%p2155_p4), %s291_s4, 64  }
  0x62   : > { %1856 = vsyncadd (%p2155_p4), %s291_s4, 4294967232 }
  0x63   : > { %1858 = dma.done.wait (%p59_p2), [#allocation9], 7168  }
  0x64   : > { %1860 = vsyncadd (%p59_p2), [#allocation9], 4294960128  ;;  %s2337_s1 = sld [smem:[#allocation18_spill]]  ;;  %v1442_v0 = vld [vmem:[#allocation8 + $0x38] sm:$0xff]  ;;  %v1441_v3 = vld [vmem:[#allocation8 + $0x30] sm:$0xff]  ;;  %vm366_vm1 = vcmask 1043456  }
  0x65   : > { %v1450_v1 = vld [vmem:[#allocation8 + $0x78] sm:$0xff]  ;;  %906 = vmatpush.bf16.msra.mxu0 %v1442_v0  ;;  %v1449_v4 = vld [vmem:[#allocation8 + $0x70] sm:$0xff]  ;;  %v1440_v7 = vld [vmem:[#allocation8 + $0x28] sm:$0xff]  ;;  %vm382_vm3 = vcmask 1045504   ;;  %vm386_vm4 = vsmask.f32 5376 }
  0x66   : > { %v1458_v2 = vld [vmem:[#allocation8 + $0xb8] sm:$0xff]  ;;  %919 = vmatpush.bf16.msra.mxu1 %v1450_v1  ;;  %v1457_v5 = vld [vmem:[#allocation8 + $0xb0] sm:$0xff]  ;;  %v1448_v8 = vld [vmem:[#allocation8 + $0x68] sm:$0xff]  ;;  %vm399_vm5 = vcmask 1044480   ;;  %s2340_s7 = sld [smem:[#allocation19_spill]]  ;;  %s1205_s19 = sshll.u32 %s2165_s15, 3 }
  0x67   : > { %932 = vmatpush.bf16.msra.mxu2 %v1458_v2  ;;  %v1466_v6 = vld [vmem:[#allocation8 + $0xf8] sm:$0xff]  ;;  %v1456_v9 = vld [vmem:[#allocation8 + $0xa8] sm:$0xff]  ;;  %v1465_v10 = vld [vmem:[#allocation8 + $0xf0] sm:$0xff]  ;;  %s2341_s10 = sld [smem:[#allocation31_spill]]  ;;  %vm1017_vm7 = vcmask 1040384   ;;  %s344_s0 = scalar_lea.vmem [#allocation10], %s1205_s19 }
  0x68   : > { %945 = vmatpush.bf16.msra.mxu3 %v1466_v6  ;;  %v1439_v12 = vld [vmem:[#allocation8 + $0x20] sm:$0xff]  ;;  %v1464_v15 = vld [vmem:[#allocation8 + $0xe8] sm:$0xff]  ;;  %v351_v18 = vld [vmem:[%s294_s25] sm:$0xf]  ;;  %s1037_s9 = sshll.u32 %s344_s0, 4  ;;  %vm1019_vm8 = vcmask 1041408   ;;  %s1038_s9 = int_to_ptr.vmem [resolvable:$true] %s1037_s9 }
  0x69   : > { %907 = vmatpush.bf16.msra.mxu0 %v1441_v3  ;;  %v1447_v13 = vld [vmem:[#allocation8 + $0x60] sm:$0xff]  ;;  %v350_v17 = vld [vmem:[%s2169_s5] sm:$0xf]  ;;  %v1438_v20 = vld [vmem:[#allocation8 + $0x18] sm:$0xff]  ;;  %s1023_s4 = scalar_lea.sflag [#allocation4], %s2165_s15 }
  0x6a   : > { %p353_p1 = scmp.eq.s32.totalorder %s2337_s1, 0  ;;  %920 = vmatpush.bf16.msra.mxu1 %v1449_v4  ;;  %v1455_v14 = vld [vmem:[#allocation8 + $0xa0] sm:$0xff]  ;;  %v364_v19 = vunpack.c.l.b16 %v350_v17  ;;  %v1446_v21 = vld [vmem:[#allocation8 + $0x58] sm:$0xff]  ;;  %v1437_v27 = vld [vmem:[#allocation8 + $0x10] sm:$0xff]  ;;  %p358_p2 = scmp.eq.s32.totalorder %s2337_s1, 2 }
  0x6b   : > { %933 = vmatpush.bf16.msra.mxu2 %v1457_v5  ;;  %v1454_v23 = vld [vmem:[#allocation8 + $0x98] sm:$0xff]  ;;  %v1463_v24 = vld [vmem:[#allocation8 + $0xe0] sm:$0xff]  ;;  %v1445_v28 = vld [vmem:[#allocation8 + $0x50] sm:$0xff]  ;;  %s1430_s26 = sshll.u32 %s2337_s1, 3 }
  0x6c   : > { %s354_s24 = scalar_select %p353_p1, 1, 0  ;;  %946 = vmatpush.bf16.msra.mxu3 %v1465_v10  ;;  %v365_v25 = vpack.c.b16 %v364_v19, %v364_v19  ;;  %v1453_v31 = vld [vmem:[#allocation8 + $0x90] sm:$0xff]  ;;  %v1462_v32 = vld [vmem:[#allocation8 + $0xd8] sm:$0xff]  ;;  %v1436_v37 = vld [vmem:[#allocation8 + $0x8] sm:$0xff] }
  0x6d   : > { %908 = vmatpush.bf16.msra.mxu0 %v1440_v7  ;;  %v1444_v38 = vld [vmem:[#allocation8 + $0x48] sm:$0xff]  ;;  %v1461_v42 = vld [vmem:[#allocation8 + $0xd0] sm:$0xff]  ;;  %s2214_s29 = scalar_select %p358_p2, 1, 0  ;;  %v1435_v49 = vld [vmem:[#allocation8] sm:$0xff] }
  0x6e   : > { %v355_v11 = vstv %s354_s24  ;;  %921 = vmatpush.bf16.msra.mxu1 %v1448_v8  ;;  %v1452_v41 = vld [vmem:[#allocation8 + $0x88] sm:$0xff]  ;;  %v1443_v50 = vld [vmem:[#allocation8 + $0x40] sm:$0xff]  ;;  %v1474_v54 = vld [vmem:[#allocation8 + $0x138] sm:$0xff]  ;;  %s1491_s27 = smul.u32 3, %s2340_s7 }
  0x6f   : > { %934 = vmatpush.bf16.msra.mxu2 %v1456_v9  ;;  %vm2197_vm0 = vcmp.eq.s32.totalorder %v355_v11, 1  ;;  %v1451_v53 = vld [vmem:[#allocation8 + $0x80] sm:$0xff]  ;;  %v360_v55 = vstv %s2214_s29  ;;  %v1482_v58 = vld [vmem:[#allocation8 + $0x178] sm:$0xff]  ;;  %v1460_v60 = vld [vmem:[#allocation8 + $0xc8] sm:$0xff] }
  0x70   : > { %v357_v22 = vsel %vm2197_vm0, 0, %v351_v18  ;;  %947 = vmatpush.bf16.msra.mxu3 %v1464_v15  ;;  %v1490_v59 = vld [vmem:[#allocation8 + $0x1b8] sm:$0xff]  ;;  %vm361_vm2 = vcmp.eq.s32.totalorder %v360_v55, 1  ;;  %v1473_v3 = vld [vmem:[#allocation8 + $0x130] sm:$0xff]  ;;  %v1459_v7 = vld [vmem:[#allocation8 + $0xc0] sm:$0xff]  ;;  %s1033_s3 = sadd.s32 %s2337_s1, %s1491_s27  ;;  %s1781_s1 = scalar_lea.hbm %s2341_s10, 48 }
  0x71   : > { %909 = vmatpush.bf16.msra.mxu0 %v1439_v12  ;;  %v2206_v26 = vsel %vm366_vm1, %v357_v22, %v365_v25  ;;  %v352_v1 = vld [vmem:[%s304_s13] sm:$0xf]  ;;  %v1481_v4 = vld [vmem:[#allocation8 + $0x170] sm:$0xff]  ;;  %v1472_v10 = vld [vmem:[#allocation8 + $0x128] sm:$0xff]  ;;  %s1432_s23 = sshll.u32 %s1033_s3, 3 }
  0x72   : > { %922 = vmatpush.bf16.msra.mxu1 %v1447_v13  ;;  %v377_v29 = vrot.slane %v2206_v26, 1  ;;  %v372_v30 = vshll.u32 %v2206_v26, 16  ;;  %v370_v33 = vshrl.u32 %v2206_v26, 16  ;;  %v1489_v5 = vld [vmem:[#allocation8 + $0x1b0] sm:$0xff]  ;;  %v362_v6 = vsel %vm361_vm2, 0, %v352_v1  ;;  %v1480_v11 = vld [vmem:[#allocation8 + $0x168] sm:$0xff]  ;;  %s1035_s14 = scalar_lea.hbm %s2341_s10, %s1432_s23 }
  0x73   : > { %935 = vmatpush.bf16.msra.mxu2 %v1455_v14  ;;  %v1488_v12 = vld [vmem:[#allocation8 + $0x1a8] sm:$0xff]  ;;  %v391_v13 = vshrl.u32 %v362_v6, 16  ;;  %v394_v14 = vshll.u32 %v362_v6, 16  ;;  %v1471_v16 = vld [vmem:[#allocation8 + $0x120] sm:$0xff]  ;;  %v383_v22 = vrot.slane %v2206_v26, 2  ;;  %v1478_v25 = vld [vmem:[#allocation8 + $0x158] sm:$0xff]  ;;  %v998_v1 = vlaneseq }
  0x74   : > { %948 = vmatpush.bf16.msra.mxu3 %v1463_v24  ;;  %v374_v34 = vrot.slane %v372_v30, 1  ;;  %v378_v35 = vrot.slane %v370_v33, 1  ;;  %v379_v36 = vrot.slane %v372_v30, 2  ;;  %v524_v39 = vshrl.u32 %v377_v29, 16  ;;  %v1479_v19 = vld [vmem:[#allocation8 + $0x160] sm:$0xff]  ;;  %s1039_s30 = sshll.u32 %s1035_s14, 4  ;;  %s1040_s30 = int_to_ptr.hbm [resolvable:$true] %s1039_s30 }
  0x75   : > { %910 = vmatpush.bf16.msra.mxu0 %v1438_v20  ;;  %v527_v40 = vshll.u32 %v377_v29, 16  ;;  %v387_v44 = vrot.slane %v370_v33, 2  ;;  %v388_v45 = vrot.slane %v372_v30, 3  ;;  %v393_v17 = vrot.slane %v391_v13, 2  ;;  %v1487_v20 = vld [vmem:[#allocation8 + $0x1a0] sm:$0xff]  ;;  %v1469_v30 = vld [vmem:[#allocation8 + $0x110] sm:$0xff] }
  0x76   : > { %923 = vmatpush.bf16.msra.mxu1 %v1446_v21  ;;  %v375_v43 = vor.u32 %v374_v34, %v370_v33  ;;  %v380_v48 = vor.u32 %v379_v36, %v378_v35  ;;  %v526_v51 = vrot.slane %v524_v39, 2  ;;  %v396_v18 = vrot.slane %v394_v14, 3  ;;  %v1470_v21 = vld [vmem:[#allocation8 + $0x118] sm:$0xff]  ;;  %v1477_v33 = vld [vmem:[#allocation8 + $0x150] sm:$0xff]  ;;  %s1775_s25 = sshra.s32 %s1040_s30, 4  ;;  %s1776_s25 = int_to_ptr.hbm [resolvable:$true] %s1775_s25 }
  0x77   : > { %936 = vmatpush.bf16.msra.mxu2 %v1454_v23  ;;  %v529_v52 = vrot.slane %v527_v40, 3  ;;  %v389_v61 = vor.u32 %v388_v45, %v387_v44  ;;  %v384_v23 = vrot.slane %v362_v6, 2  ;;  %v401_v29 = vrot.slane %v362_v6, 3  ;;  %v1485_v34 = vld [vmem:[#allocation8 + $0x190] sm:$0xff]  ;;  %s1777_s2 = scalar_lea.hbm %s1776_s25, 8  ;;  %p1782_p5 = scmp.lt.s32.totalorder %s1776_s25, %s2341_s10 }
  0x78   : > { %949 = vmatpush.bf16.msra.mxu3 %v1462_v32  ;;  %v516_v46 = vshrl.u32 %v375_v43, 16  ;;  %v519_v47 = vshll.u32 %v375_v43, 16  ;;  %v532_v62 = vshrl.u32 %v380_v48, 16  ;;  %v535_v63 = vshll.u32 %v380_v48, 16  ;;  %v1484_v43 = vld [vmem:[#allocation8 + $0x188] sm:$0xff]  ;;  %p1778_p10 = scmp.ne.s32.totalorder %s1776_s25, %s1777_s2  ;;  %p1783_p6 = scmp.lt.s32.totalorder %s1781_s1, %s1777_s2 }
  0x79   : > { %911 = vmatpush.bf16.msra.mxu0 %v1437_v27  ;;  %v530_v0 = vor.u32 %v529_v52, %v526_v51  ;;  %v397_v24 = vor.u32 %v396_v18, %v393_v17  ;;  %v1486_v27 = vld [vmem:[#allocation8 + $0x198] sm:$0xff]  ;;  %v1475_v51 = vld [vmem:[#allocation8 + $0x140] sm:$0xff]  ;;  %v1000_v6 = vstv %s1430_s26 }
  0x7a   : > { %924 = vmatpush.bf16.msra.mxu1 %v1445_v28  ;;  %v518_v56 = vrot.slane %v516_v46, 2  ;;  %v521_v57 = vrot.slane %v519_v47, 3  ;;  %v534_v8 = vrot.slane %v532_v62, 2  ;;  %v537_v9 = vrot.slane %v535_v63, 3  ;;  %v1467_v46 = vld [vmem:[#allocation8 + $0x100] sm:$0xff]  ;;  %p1779_p12 = pnand %p1778_p10, %p2118_p8  ;;  %p1784_p11 = por %p1783_p6, %p1782_p5 }
  0x7b   : > { %937 = vmatpush.bf16.msra.mxu2 %v1453_v31  ;;  %v400_v28 = vrot.slane %v2206_v26, 3  ;;  %v385_v31 = vsel %vm382_vm3, %v383_v22, %v384_v23  ;;  %v398_v32 = vsel %vm386_vm4, %v389_v61, %v397_v24  ;;  %v1483_v52 = vld [vmem:[#allocation8 + $0x180] sm:$0xff] }
  0x7c   : > { %950 = vmatpush.bf16.msra.mxu3 %v1461_v42  ;;  %v522_v2 = vor.u32 %v521_v57, %v518_v56  ;;  %v538_v15 = vor.u32 %v537_v9, %v534_v8  ;;  %v540_v36 = vshrl.u32 %v385_v31, 16  ;;  %v548_v39 = vshrl.u32 %v398_v32, 16  ;;  %v1476_v42 = vld [vmem:[#allocation8 + $0x148] sm:$0xff]  ;;  %p1780_p13 = pneg %p1779_p12 }
  0x7d   : > { %912 = vmatpush.bf16.msra.mxu0 %v1436_v37  ;;  %v402_v35 = vsel %vm399_vm5, %v400_v28, %v401_v29  ;;  %v543_v37 = vshll.u32 %v385_v31, 16  ;;  %v551_v40 = vshll.u32 %v398_v32, 16 }
  0x7e   : > { %925 = vmatpush.bf16.msra.mxu1 %v1444_v38  ;;  %v1468_v38 = vld [vmem:[#allocation8 + $0x108] sm:$0xff]  ;;  %v559_v26 = vshll.u32 %v402_v35, 16  ;;  %v542_v44 = vrot.slane %v540_v36, 2  ;;  %v550_v47 = vrot.slane %v548_v39, 2  ;;  %p1785_p0 = pnand %p1784_p11, %p1780_p13 }
  0x7f   : > { %938 = vmatpush.bf16.msra.mxu2 %v1452_v41  ;;  %v556_v41 = vshrl.u32 %v402_v35, 16  ;;  %v545_v45 = vrot.slane %v543_v37, 3  ;;  %v553_v48 = vrot.slane %v551_v40, 3 }
  0x80   : > { %951 = vmatpush.bf16.msra.mxu3 %v1460_v60 }
  0x81   : > { %913 = vmatpush.bf16.msra.mxu0 %v1435_v49  ;;  %v558_v49 = vrot.slane %v556_v41, 2 }
  0x82   : > { %926 = vmatpush.bf16.msra.mxu1 %v1443_v50  ;;  %v561_v50 = vrot.slane %v559_v26, 3 }
  0x83   : > { %939 = vmatpush.bf16.msra.mxu2 %v1451_v53  ;;  %v546_v53 = vor.u32 %v545_v45, %v542_v44 }
  0x84   : > { %914 = vmatmul.bf16.vlgmr.msra.gmra.mxu0 %v389_v61  ;;  %952 = vmatpush.bf16.msra.mxu3 %v1459_v7  ;;  %v562_v55 = vor.u32 %v561_v50, %v558_v49 }
  0x85   : > { %958 = vmatpush.bf16.msrb.mxu0 %v1474_v54  ;;  %927 = vmatmul.bf16.vlgmr.msra.gmra.mxu1 %v522_v2  ;;  %v554_v54 = vor.u32 %v553_v48, %v550_v47 }
  0x86   : > { %971 = vmatpush.bf16.msrb.mxu1 %v1482_v58  ;;  %940 = vmatmul.bf16.vlgmr.msra.gmra.mxu2 %v530_v0 }
  0x87   : > { %984 = vmatpush.bf16.msrb.mxu2 %v1490_v59  ;;  %953 = vmatmul.bf16.vlgmr.msra.gmra.mxu3 %v538_v15 }
  0x89   : > { %959 = vmatpush.bf16.msrb.mxu0 %v1473_v3  ;;  %v999_v3 = vshrl.u32 %v998_v1, 7 }
  0x8a   : > { %972 = vmatpush.bf16.msrb.mxu1 %v1481_v4 }
  0x8b   : > { %985 = vmatpush.bf16.msrb.mxu2 %v1489_v5  ;;  %v1001_v9 = vadd.s32 %v1000_v6, %v999_v3 }
  0x8d   : > { %960 = vmatpush.bf16.msrb.mxu0 %v1472_v10  ;;  %vm1002_vm6 = vcmp.lt.s32.totalorder %v1001_v9, 19 }
  0x8e   : > { %973 = vmatpush.bf16.msrb.mxu1 %v1480_v11 }
  0x8f   : > { %986 = vmatpush.bf16.msrb.mxu2 %v1488_v12 }
  0x91   : > { %961 = vmatpush.bf16.msrb.mxu0 %v1471_v16 }
  0x92   : > { %974 = vmatpush.bf16.msrb.mxu1 %v1479_v19 }
  0x93   : > { %987 = vmatpush.bf16.msrb.mxu2 %v1487_v20 }
  0x95   : > { %962 = vmatpush.bf16.msrb.mxu0 %v1470_v21 }
  0x96   : > { %975 = vmatpush.bf16.msrb.mxu1 %v1478_v25 }
  0x97   : > { %988 = vmatpush.bf16.msrb.mxu2 %v1486_v27 }
  0x99   : > { %963 = vmatpush.bf16.msrb.mxu0 %v1469_v30 }
  0x9a   : > { %976 = vmatpush.bf16.msrb.mxu1 %v1477_v33 }
  0x9b   : > { %989 = vmatpush.bf16.msrb.mxu2 %v1485_v34 }
  0x9d   : > { %964 = vmatpush.bf16.msrb.mxu0 %v1468_v38 }
  0x9e   : > { %977 = vmatpush.bf16.msrb.mxu1 %v1476_v42 }
  0x9f   : > { %990 = vmatpush.bf16.msrb.mxu2 %v1484_v43 }
  0xa1   : > { %965 = vmatpush.bf16.msrb.mxu0 %v1467_v46 }
  0xa2   : > { %978 = vmatpush.bf16.msrb.mxu1 %v1475_v51 }
  0xa3   : > { %991 = vmatpush.bf16.msrb.mxu2 %v1483_v52 }
  0xa4   : > { %966 = vmatmul.bf16.vlgmr.msrb.gmra.mxu0 %v546_v53 }
  0xa5   : > { %979 = vmatmul.bf16.vlgmr.msrb.gmra.mxu1 %v554_v54 }
  0xa6   : > { %992 = vmatmul.bf16.vlgmr.msrb.gmra.mxu2 %v562_v55 }
 0x101   : > { %v915_v56 = vpop.f32.mrf.mxu0 }
 0x102   : > { %v928_v57 = vpop.f32.mrf.mxu1 }
 0x103   : > { %v929_v63 = vadd.f32 %v928_v57, %v915_v56 }
 0x109   : > { %v941_v58 = vpop.f32.mrf.mxu2  ;;  %v917_v59 = vpop.f32.mrf.mxu0 }
 0x10a   : > { %v930_v60 = vpop.f32.mrf.mxu1  ;;  %v954_v61 = vpop.f32.mrf.mxu3  ;;  %v942_v2 = vadd.f32 %v941_v58, %v929_v63 }
 0x10c   : > { %v955_v4 = vadd.f32 %v954_v61, %v942_v2 }
 0x111   : > { %v943_v62 = vpop.f32.mrf.mxu2 }
 0x112   : > { %v956_v0 = vpop.f32.mrf.mxu3 }
 0x121   : > { %v967_v5 = vpop.f32.mrf.mxu0 }
 0x122   : > { %v980_v7 = vpop.f32.mrf.mxu1  ;;  %v968_v8 = vadd.f32 %v967_v5, %v955_v4 }
 0x124   : > { %v981_v10 = vadd.f32 %v980_v7, %v968_v8 }
 0x129   : > { %v993_v11 = vpop.f32.mrf.mxu2  ;;  %v969_v13 = vpop.f32.mrf.mxu0 }
 0x12a   : > { %v994_v12 = vadd.f32 %v993_v11, %v981_v10  ;;  %v982_v14 = vpop.f32.mrf.mxu1 }
 0x12c   : > { %v1003_v15 = vsel %vm1002_vm6, %v994_v12, 0.0 }
 0x12d   : > { %v1004_v16 = vrot.slane %v1003_v15, 4  ;;  %v1010_v17 = vmul.f32 %v1003_v15, %v1003_v15 }
 0x12f   : > { %v1005_v18 = vadd.f32 %v1004_v16, %v1003_v15  ;;  %v1011_v19 = vrot.slane %v1010_v17, 4 }
 0x131   : > { %v1006_v20 = vrot.slane %v1005_v18, 2  ;;  %v1012_v21 = vadd.f32 %v1011_v19, %v1010_v17  ;;  %v995_v22 = vpop.f32.mrf.mxu2 }
 0x133   : > { %v1007_v23 = vadd.f32 %v1006_v20, %v1005_v18  ;;  %v1013_v24 = vrot.slane %v1012_v21, 2 }
 0x135   : > { %v1008_v25 = vrot.slane %v1007_v23, 1  ;;  %v1014_v27 = vadd.f32 %v1013_v24, %v1012_v21 }
 0x137   : > { %v1015_v28 = vrot.slane %v1014_v27, 1  ;;  %v1009_v29 = vadd.f32 %v1008_v25, %v1007_v23 }
 0x139   : > { %v1016_v30 = vadd.f32 %v1015_v28, %v1014_v27 }
 0x13b   : > { %v1018_v31 = vsel %vm1017_vm7, %v1009_v29, %v1016_v30 }
 0x13c   : > { %v1020_v32 = vsel %vm1019_vm8, %v1018_v31, 0.0 }
 0x13d   : > { %1021 = vst [vmem:[%s344_s0] sm:$0xff] %v1020_v32 }
 0x13e   : > { %1788 = shalt.err (!%p1785_p0)
}
 0x13f   : > { %1502 = dma.vmem_to_hbm [thread:$0]  (%p2118_p8), %s1038_s9, 128, %s1040_s30, %s1023_s4  }
 0x140 PF: > { %p1525_p3 = scmp.ge.s32.totalorder %s1919_s28, 2  ;;  %s1051_s15 = sand.u32 1, %s1891_s21  }
 0x141   : > { %s1052_s7 = scalar_lea.sflag [#allocation4], %s1051_s15 }
 0x142   : > { %p1519_p4 = pnand %p1525_p3, %p2122_p7 }
 0x144   : > { %p1520_p9 = pneg %p1519_p4 }
 0x146   : > { %1862 = dma.done.wait (%p1520_p9), %s1052_s7, 128  }
 0x147   : > { %1864 = vsyncadd (%p1520_p9), %s1052_s7, 4294967168  ;;  %s24_s28 = sadd.s32 1, %s1919_s28   ;;  %s2343_s18 = sld [smem:[#allocation16_spill]] }
 0x148   : > { %p2244_p1 = scmp.ge.s32.totalorder %s24_s28, 8   ;;  %s2344_s12 = sld [smem:[#allocation25_spill]] }
 0x149   : > { %s2345_s27 = sld [smem:[#allocation17_spill]]  ;;  %s2352_s15 = smov %s1871_s16 }
 0x14a   : > { %s2346_s23 = sld [smem:[#allocation26_spill]]  ;;  %s2353_s16 = smov %s1875_s17 }
 0x14b   : > { %s2347_s24 = sld [smem:[#allocation20_spill]]  ;;  %s2354_s17 = smov %s2146_s6 }
 0x14c   : > { %s2348_s25 = sld [smem:[#allocation21_spill]]  ;;  %s2355_s19 = smov %s1887_s20 }
 0x14d   : > { %s2349_s8 = sld [smem:[#allocation22_spill]]  ;;  %s2357_s21 = smov %s1895_s22 }
 0x14e   : > { %s2350_s3 = sld [smem:[#allocation23_spill]]  ;;  %s2356_s20 = smov %s2344_s12 }
 0x14f   : > { %s2358_s22 = smov %s2345_s27 }
 0x150   :  { %23 = sbr.rel (!%p2244_p1) target bundleno = 19 (0x13), region = 109 }
 0x153   : > { %s2359_s26 = smov %s2349_s8 }
 0x154   : > { %s2360_s27 = smov %s2350_s3 }
 0x155   :  { %1058 = vsyncpa [#allocation3], 1 }
 0x156   :  { %1060 = vsyncpa [#allocation3 + $0x1], 1 }
 0x157   :  { %1061 = vsyncpa [#allocation6], 1 }
 0x158   :  { %1063 = vsyncpa [#allocation6 + $0x1], 1 }
 0x159   :  { %1064 = vsyncpa [#allocation9], 1 }
 0x15a   :  { %1065 = vsyncpa [#allocation4], 1 }
 0x15b   :  { %1067 = vsyncpa [#allocation4 + $0x1], 1 }

</bundles_post_ra>
